<compile_context>
chip_gen: v7x
topology: tpu7x:2x2x1
jax: 0.10.0
libtpu: 0.0.40
codegen_flags: <defaults>
</compile_context>

<pallas_src>
import jax
import jax.numpy as jnp
from jax.experimental import pallas as pl
from jax.experimental.pallas import tpu as pltpu

C = 16            # channels fixed by MALayer(16, 4)
RED = 4           # reduction factor
CR = C // RED     # squeezed channels (4)
CR_PAD = 8        # squeezed channels zero-padded to a full sublane group
NEG_SLOPE = 0.2   # LeakyReLU negative slope


def _leaky_relu(v):
    return jnp.where(v >= 0, v, NEG_SLOPE * v)


def se_leaky_kernel(x_ref, w1_ref, b1_ref, w2_ref, b2_ref, o_ref):
    """One grid step = one image laid out as (C, H*W).

    w1_ref: (C, CR_PAD)  transposed 16->4 1x1-conv weight (zero-padded cols)
    b1_ref: (1, CR_PAD)  its bias (zero-padded)
    w2_ref: (C, CR_PAD)  4->16 1x1-conv weight (zero-padded cols)
    b2_ref: (C, 1)       its bias
    """
    x = x_ref[0]                                                   # (C, HW)

    # Squeeze: global average pool over the spatial (lane) axis.
    m = jnp.mean(x, axis=1, keepdims=True)                         # (C, 1)

    # Excite FC1 (C -> CR): lane-broadcast m, reduce over sublanes.
    h = jnp.sum(w1_ref[...] * m, axis=0, keepdims=True) + b1_ref[...]   # (1, CR_PAD)
    h = jnp.maximum(h, 0.0)                                        # ReLU

    # Excite FC2 (CR -> C): sublane-broadcast h, reduce over lanes.
    g = jnp.sum(w2_ref[...] * h, axis=1, keepdims=True) + b2_ref[...]   # (C, 1)
    g = 1.0 / (1.0 + jnp.exp(-g))                                  # Sigmoid gate

    # Channel-wise rescale (lane-broadcast of the gate) + LeakyReLU(0.2).
    o_ref[0] = _leaky_relu(x * g)


@jax.jit
def branch_block_front(x_nchw, params):
    """Pallas implementation of branch_block_front.forward (NCHW in/out)."""
    w1, b1, w2, b2 = params                    # (CR, C), (CR,), (C, CR), (C,)
    N, Cc, H, W = x_nchw.shape
    assert Cc == C, "MALayer(16, 4) requires 16 input channels"
    HW = H * W

    # Lane-dense layout: NCHW -> (N, C, H*W) is a pure reshape (no transpose).
    x = x_nchw.reshape(N, Cc, HW).astype(jnp.float32)

    # Pad the squeezed dim 4 -> 8 with zeros; padded rows/cols contribute
    # exactly zero, so results are identical to the unpadded math.
    f32 = jnp.float32
    w1p = jnp.zeros((C, CR_PAD), f32).at[:, :CR].set(w1.astype(f32).T)
    b1p = jnp.zeros((1, CR_PAD), f32).at[0, :CR].set(b1.astype(f32))
    w2p = jnp.zeros((C, CR_PAD), f32).at[:, :CR].set(w2.astype(f32))
    b2p = b2.astype(f32).reshape(C, 1)

    out = pl.pallas_call(
        se_leaky_kernel,
        out_shape=jax.ShapeDtypeStruct((N, Cc, HW), jnp.float32),
        grid_spec=pltpu.PrefetchScalarGridSpec(
            num_scalar_prefetch=0,
            grid=(N,),                                  # independent images
            in_specs=[
                pl.BlockSpec((1, Cc, HW), lambda n: (n, 0, 0)),
                pl.BlockSpec((C, CR_PAD), lambda n: (0, 0)),
                pl.BlockSpec((1, CR_PAD), lambda n: (0, 0)),
                pl.BlockSpec((C, CR_PAD), lambda n: (0, 0)),
                pl.BlockSpec((C, 1), lambda n: (0, 0)),
            ],
            out_specs=pl.BlockSpec((1, Cc, HW), lambda n: (n, 0, 0)),
        ),
        compiler_params=pltpu.CompilerParams(
            dimension_semantics=("parallel",)),         # v7x: 2 TCs split batch
    )(x, w1p, b1p, w2p, b2p)

    return out.reshape(N, Cc, H, W)


def init_params(key):
    """PyTorch Conv2d(k=1)-style uniform init in +-1/sqrt(fan_in)."""
    k1, k2, k3, k4 = jax.random.split(key, 4)
    b_in = 1.0 / (C ** 0.5)      # fan_in of the 16 -> 4 1x1 conv
    b_hid = 1.0 / (CR ** 0.5)    # fan_in of the 4 -> 16 1x1 conv
    w1 = jax.random.uniform(k1, (CR, C), jnp.float32, -b_in, b_in)
    b1 = jax.random.uniform(k2, (CR,), jnp.float32, -b_in, b_in)
    w2 = jax.random.uniform(k3, (C, CR), jnp.float32, -b_hid, b_hid)
    b2 = jax.random.uniform(k4, (C,), jnp.float32, -b_hid, b_hid)
    return w1, b1, w2, b2


def reference_forward(x_nchw, params):
    """Pure-JAX reference: SE channel attention + LeakyReLU(0.2)."""
    w1, b1, w2, b2 = params
    x = x_nchw.astype(jnp.float32)
    m = jnp.mean(x, axis=(2, 3))                         # (N, C) global avg pool
    h = jnp.maximum(m @ w1.T + b1, 0.0)                  # (N, CR)
    g = 1.0 / (1.0 + jnp.exp(-(h @ w2.T + b2)))          # (N, C) sigmoid gate
    y = x * g[:, :, None, None]
    return _leaky_relu(y)


if __name__ == "__main__":
    key = jax.random.PRNGKey(0)
    k_x, k_p = jax.random.split(key)
    # Small NCHW input consistent with the module (channels must be 16).
    x = jax.random.normal(k_x, (2, C, 16, 16), jnp.float32)
    params = init_params(k_p)

    out = jax.block_until_ready(branch_block_front(x, params))
    ref = reference_forward(x, params)

    assert out.shape == x.shape and out.dtype == jnp.float32
    assert jnp.allclose(out, ref, atol=1e-4, rtol=1e-4), "mismatch vs reference"

    print("KERNEL_OK")
</pallas_src>

<mosaic_0001>
module attributes {stable_mosaic.version = 11 : i64} {
  func.func @se_leaky_kernel(%arg0: i32, %arg1: memref<1x16x256xf32, #tpu.memory_space<vmem>>, %arg2: memref<16x8xf32, #tpu.memory_space<vmem>>, %arg3: memref<1x8xf32, #tpu.memory_space<vmem>>, %arg4: memref<16x8xf32, #tpu.memory_space<vmem>>, %arg5: memref<16x1xf32, #tpu.memory_space<vmem>>, %arg6: memref<1x16x256xf32, #tpu.memory_space<vmem>>) attributes {dimension_semantics = [#tpu.dimension_semantics<parallel>], iteration_bounds = array<i64: 2>, scalar_prefetch = 0 : i64, scratch_operands = 0 : i64, tpu.core_type = #tpu.core_type<tc>, window_params = [{transform_indices = @transform_0, window_bounds = array<i64: 1, 16, 256>}, {pipeline_mode = #tpu.pipeline_mode<synchronous>, transform_indices = @transform_1, window_bounds = array<i64: 16, 8>}, {pipeline_mode = #tpu.pipeline_mode<synchronous>, transform_indices = @transform_2, window_bounds = array<i64: 1, 8>}, {pipeline_mode = #tpu.pipeline_mode<synchronous>, transform_indices = @transform_3, window_bounds = array<i64: 16, 8>}, {pipeline_mode = #tpu.pipeline_mode<synchronous>, transform_indices = @transform_4, window_bounds = array<i64: 16, 1>}, {transform_indices = @transform_5, window_bounds = array<i64: 1, 16, 256>}]} {
    %c0 = arith.constant 0 : index
    %c0_0 = arith.constant 0 : index
    %c0_1 = arith.constant 0 : index
    %0 = vector.load %arg1[%c0, %c0_0, %c0_1] : memref<1x16x256xf32, #tpu.memory_space<vmem>>, vector<1x16x256xf32>
    %1 = vector.shape_cast %0 : vector<1x16x256xf32> to vector<16x256xf32>
    %cst = arith.constant dense<0.000000e+00> : vector<16xf32>
    %2 = vector.multi_reduction <add>, %1, %cst [1] : vector<16x256xf32> to vector<16xf32>
    %3 = vector.shape_cast %2 : vector<16xf32> to vector<16x1xf32>
    %cst_2 = arith.constant 2.560000e+02 : f32
    %4 = vector.broadcast %cst_2 : f32 to vector<16x1xf32>
    %5 = arith.divf %3, %4 : vector<16x1xf32>
    %c0_3 = arith.constant 0 : index
    %c0_4 = arith.constant 0 : index
    %6 = vector.load %arg2[%c0_3, %c0_4] : memref<16x8xf32, #tpu.memory_space<vmem>>, vector<16x8xf32>
    %7 = vector.broadcast %5 : vector<16x1xf32> to vector<16x8xf32>
    %8 = arith.mulf %6, %7 : vector<16x8xf32>
    %cst_5 = arith.constant dense<0.000000e+00> : vector<8xf32>
    %9 = vector.multi_reduction <add>, %8, %cst_5 [0] : vector<16x8xf32> to vector<8xf32>
    %10 = vector.shape_cast %9 : vector<8xf32> to vector<1x8xf32>
    %c0_6 = arith.constant 0 : index
    %c0_7 = arith.constant 0 : index
    %11 = vector.load %arg3[%c0_6, %c0_7] : memref<1x8xf32, #tpu.memory_space<vmem>>, vector<1x8xf32>
    %12 = arith.addf %10, %11 : vector<1x8xf32>
    %cst_8 = arith.constant 0.000000e+00 : f32
    %13 = vector.broadcast %cst_8 : f32 to vector<1x8xf32>
    %14 = arith.maximumf %12, %13 : vector<1x8xf32>
    %c0_9 = arith.constant 0 : index
    %c0_10 = arith.constant 0 : index
    %15 = vector.load %arg4[%c0_9, %c0_10] : memref<16x8xf32, #tpu.memory_space<vmem>>, vector<16x8xf32>
    %16 = vector.broadcast %14 : vector<1x8xf32> to vector<16x8xf32>
    %17 = arith.mulf %15, %16 : vector<16x8xf32>
    %cst_11 = arith.constant dense<0.000000e+00> : vector<16xf32>
    %18 = vector.multi_reduction <add>, %17, %cst_11 [1] : vector<16x8xf32> to vector<16xf32>
    %19 = vector.shape_cast %18 : vector<16xf32> to vector<16x1xf32>
    %c0_12 = arith.constant 0 : index
    %c0_13 = arith.constant 0 : index
    %20 = vector.load %arg5[%c0_12, %c0_13] : memref<16x1xf32, #tpu.memory_space<vmem>>, vector<16x1xf32>
    %21 = arith.addf %19, %20 : vector<16x1xf32>
    %cst_14 = arith.constant 0.000000e+00 : f32
    %22 = vector.broadcast %cst_14 : f32 to vector<16x1xf32>
    %23 = arith.subf %22, %21 : vector<16x1xf32>
    %24 = math.exp %23 : vector<16x1xf32>
    %cst_15 = arith.constant 1.000000e+00 : f32
    %25 = vector.broadcast %cst_15 : f32 to vector<16x1xf32>
    %26 = arith.addf %25, %24 : vector<16x1xf32>
    %cst_16 = arith.constant 1.000000e+00 : f32
    %27 = vector.broadcast %cst_16 : f32 to vector<16x1xf32>
    %28 = arith.divf %27, %26 : vector<16x1xf32>
    %29 = vector.broadcast %28 : vector<16x1xf32> to vector<16x256xf32>
    %30 = arith.mulf %1, %29 : vector<16x256xf32>
    %cst_17 = arith.constant 0.000000e+00 : f32
    %31 = vector.broadcast %cst_17 : f32 to vector<16x256xf32>
    %32 = arith.cmpf oge, %30, %31 : vector<16x256xf32>
    %cst_18 = arith.constant 2.000000e-01 : f32
    %33 = vector.broadcast %cst_18 : f32 to vector<16x256xf32>
    %34 = arith.mulf %33, %30 : vector<16x256xf32>
    %35 = arith.select %32, %30, %34 : vector<16x256xi1>, vector<16x256xf32>
    %c0_19 = arith.constant 0 : index
    %c0_20 = arith.constant 0 : index
    %c0_21 = arith.constant 0 : index
    %36 = vector.load %arg6[%c0_19, %c0_20, %c0_21] : memref<1x16x256xf32, #tpu.memory_space<vmem>>, vector<1x16x256xf32>
    %37 = vector.shape_cast %36 : vector<1x16x256xf32> to vector<16x256xf32>
    %38 = vector.shape_cast %35 : vector<16x256xf32> to vector<1x16x256xf32>
    tpu.vector_store %arg6[%c0_19, %c0_20, %c0_21], %38 {strides = array<i32>} : memref<1x16x256xf32, #tpu.memory_space<vmem>>, vector<1x16x256xf32>,
    return
  }
  func.func @transform_0(%arg0: i32) -> (i32, i32, i32) {
    %c0_i32 = arith.constant 0 : i32
    %c0_i32_0 = arith.constant 0 : i32
    %c0_i32_1 = arith.constant 0 : i32
    return %arg0, %c0_i32, %c0_i32_0 : i32, i32, i32
  }
  func.func @transform_1(%arg0: i32) -> (i32, i32) {
    %c0_i32 = arith.constant 0 : i32
    %c0_i32_0 = arith.constant 0 : i32
    %c0_i32_1 = arith.constant 0 : i32
    return %c0_i32, %c0_i32_0 : i32, i32
  }
  func.func @transform_2(%arg0: i32) -> (i32, i32) {
    %c0_i32 = arith.constant 0 : i32
    %c0_i32_0 = arith.constant 0 : i32
    %c0_i32_1 = arith.constant 0 : i32
    return %c0_i32, %c0_i32_0 : i32, i32
  }
  func.func @transform_3(%arg0: i32) -> (i32, i32) {
    %c0_i32 = arith.constant 0 : i32
    %c0_i32_0 = arith.constant 0 : i32
    %c0_i32_1 = arith.constant 0 : i32
    return %c0_i32, %c0_i32_0 : i32, i32
  }
  func.func @transform_4(%arg0: i32) -> (i32, i32) {
    %c0_i32 = arith.constant 0 : i32
    %c0_i32_0 = arith.constant 0 : i32
    %c0_i32_1 = arith.constant 0 : i32
    return %c0_i32, %c0_i32_0 : i32, i32
  }
  func.func @transform_5(%arg0: i32) -> (i32, i32, i32) {
    %c0_i32 = arith.constant 0 : i32
    %c0_i32_0 = arith.constant 0 : i32
    %c0_i32_1 = arith.constant 0 : i32
    return %arg0, %c0_i32, %c0_i32_0 : i32, i32, i32
  }
}

</mosaic_0001>

<bundles_post_ra>
// kernel: branch_block_front.1
= control target key start
LH: loop header
LB: loop body
LE: loop exit
PB: predicated region body
PF: predicated region fallthrough
CT: control target
= control target key end

     0   :  { %s441_s18 = smov 0   ;;  %s506_s0 = inlined_call_operand.vmem [shape: f32[2,16,256], index: 0, kind: input, shape index: {}]   ;;  %s507_s1 = inlined_call_operand.vmem [shape: f32[16,8], index: 1, kind: input, shape index: {}]   ;;  %s508_s2 = inlined_call_operand.vmem [shape: f32[1,8], index: 2, kind: input, shape index: {}]   ;;  %s509_s3 = inlined_call_operand.vmem [shape: f32[16,8], index: 3, kind: input, shape index: {}]   ;;  %s510_s4 = inlined_call_operand.vmem [shape: f32[16,1], index: 4, kind: input, shape index: {}]   ;;  %s511_s5 = inlined_call_operand.vmem [shape: f32[2,16,256], index: 5, kind: output, shape index: {}]  }
   0x1 LB: > { %s370_s19 = sadd.s32 4294967295, %s408_s18   ;;  %p374_p0 = scmp.ge.s32.totalorder %s408_s18, 1  ;;  %s408_s18 = sphi %s441_s18, %s15_s18  }
   0x2   : > { %p187_p1 = scmp.lt.s32.totalorder %s408_s18, 3 }
   0x4   : > { %p188_p2 = pnand %p374_p0, %p187_p1 }
   0x5   : > { %p215_p3 = scmp.lt.s32.totalorder (!%p188_p2), %s370_s19, 1  ;;  %v238_v8 = vld [vmem:[%s507_s1] sm:$0xff] (!%p188_p2)  ;;  %v239_v9 = vld [vmem:[%s507_s1 + $0x8] sm:$0xff] (!%p188_p2)  ;;  %vm242_vm0 = vcmask (!%p188_p2), 64512   ;;  %v257_v20 = vlaneseq (!%p188_p2)  ;;  %v410_v36 = vmov (!%p188_p2), 0  }
   0x6   : > { %191 = sbr.rel (%p188_p2) target bundleno = 503 (0x1f7), region = 40  ;;  %v252_v24 = vld [vmem:[%s508_s2] sm:$0x1] (!%p188_p2)  ;;  %v256_v31 = vld [vmem:[%s509_s3 + $0x8] sm:$0xff] (!%p188_p2)  ;;  %392 = vset.pattern.permute.xlu0 (!%p188_p2), %v410_v36  ;;  %393 = vset.pattern.permute.xlu1 (!%p188_p2), %v410_v36 }
   0x7   : > { %v258_v23 = vshrl.u32 (!%p188_p2), %v257_v20, 7  ;;  %v255_v29 = vld [vmem:[%s509_s3] sm:$0xff] (!%p188_p2)  ;;  %v270_v40 = vld [vmem:[%s510_s4 + $0x8] sm:$0xff] (!%p188_p2) }
   0x8   : > { %v269_v37 = vld [vmem:[%s510_s4] sm:$0xff] (!%p188_p2) }
   0x9   : > { %v259_v27 = vsub.s32 (!%p188_p2), 0, %v258_v23 }
   0xd   : > { %s513_s19 = smov (!%p215_p3, %s370_s19), 1 }
   0xe   : > { %s381_s20 = sshll.u32 %s513_s19, 5 }
   0xf   : > { %s219_s23 = scalar_lea.vmem %s506_s0, %s381_s20  ;;  %s224_s15 = scalar_lea.vmem %s511_s5, %s381_s20 }
  0x10   : > { %v457_v0 = vld [vmem:[%s219_s23] sm:$0xff]  ;;  %v459_v1 = vld [vmem:[%s219_s23 + $0x8] sm:$0xff]  ;;  %v461_v2 = vld [vmem:[%s219_s23 + $0x10] sm:$0xff] }
  0x11   : > { %v229_v3 = vadd.f32 %v459_v1, %v457_v0  ;;  %v465_v4 = vld [vmem:[%s219_s23 + $0x18] sm:$0xff] }
  0x12   : > { %v232_v5 = vadd.f32 %v465_v4, %v461_v2 }
  0x13   : > { %230 = vadd.xlane.f32.xlu0 %v229_v3 }
  0x17   : > { %233 = vadd.xlane.f32.xlu0 %v232_v5 }
  0xa0   : > { %v231_v6 = vpop.xlane.xlu0 %230 }
  0xa1   : > { %v236_v7 = vmul.f32 0.00390625, %v231_v6 }
  0xa3   : > { %v240_v11 = vmul.f32 %v238_v8, %v236_v7 }
  0xa4   : > { %v234_v10 = vpop.xlane.xlu0 %233 }
  0xa5   : > { %v237_v12 = vmul.f32 0.00390625, %v234_v10  ;;  %v243_v14 = vsel %vm242_vm0, %v240_v11, 0.0 }
  0xa7   : > { %v241_v13 = vmul.f32 %v239_v9, %v237_v12 }
  0xa9   : > { %v244_v15 = vsel %vm242_vm0, %v241_v13, 0.0 }
  0xaa   : > { %v245_v16 = vadd.f32 %v244_v15, %v243_v14 }
  0xac   : > { %v246_v17 = vrot.slane %v245_v16, 4 }
  0xae   : > { %v247_v18 = vadd.f32 %v246_v17, %v245_v16 }
  0xb0   : > { %v248_v19 = vrot.slane %v247_v18, 2 }
  0xb2   : > { %v249_v21 = vadd.f32 %v248_v19, %v247_v18 }
  0xb4   : > { %v250_v22 = vrot.slane %v249_v21, 1 }
  0xb6   : > { %v251_v25 = vadd.f32 %v250_v22, %v249_v21 }
  0xb8   : > { %v253_v26 = vadd.f32 %v252_v24, %v251_v25 }
  0xba   : > { %v254_v28 = vmax.f32 %v253_v26, 0.0 }
  0xbc   : > { %v260_v30 = vrot.slane %v254_v28, %v259_v27 }
  0xbe   : > { %v261_v32 = vmul.f32 %v260_v30, %v255_v29  ;;  %v262_v34 = vmul.f32 %v260_v30, %v256_v31 }
  0xc0   : > { %v263_v33 = vsel %vm242_vm0, %v261_v32, 0.0  ;;  %v266_v35 = vsel %vm242_vm0, %v262_v34, 0.0 }
  0xc1   : > { %264 = vadd.xlane.f32.xlu1 %v263_v33 }
  0xc5   : > { %267 = vadd.xlane.f32.xlu1 %v266_v35 }
 0x14e   : > { %v265_v38 = vpop.xlane.xlu1 %264 }
 0x14f   : > { %v271_v39 = vadd.f32 %v269_v37, %v265_v38 }
 0x151   : > { %v273_v41 = vsub.f32 0.0, %v271_v39 }
 0x152   : > { %v268_v42 = vpop.xlane.xlu1 %267 }
 0x153   : > { %v275_v43 = vmul.f32 1.442695, %v273_v41  ;;  %v272_v44 = vadd.f32 %v270_v40, %v268_v42 }
 0x155   : > { %394 = vpow2.f32 %v275_v43  ;;  %v274_v45 = vsub.f32 0.0, %v272_v44 }
 0x157   : > { %v277_v46 = vmul.f32 1.442695, %v274_v45 }
 0x159   : > { %396 = vpow2.f32 %v277_v46 }
 0x15f   : > { %v395_v47 = vpop.eup %394 }
 0x160   : > { %v279_v48 = vadd.f32 1.0, %v395_v47 }
 0x162   : > { %398 = vrcp.f32 %v279_v48 }
 0x163   : > { %v397_v49 = vpop.eup %396 }
 0x164   : > { %v280_v50 = vadd.f32 1.0, %v397_v49 }
 0x166   : > { %400 = vrcp.f32 %v280_v50 }
 0x16c   : > { %v399_v51 = vpop.eup %398 }
 0x16d   : > { %287 = vperm.xlu0 %392, %v399_v51  }
 0x170   : > { %v401_v52 = vpop.eup %400 }
 0x171   : > { %292 = vperm.xlu1 %393, %v401_v52  }
 0x1ec   : > { %v288_v53 = vpop.permute.xlu0 %287 }
 0x1ed   : > { %v295_v54 = vmul.f32 %v288_v53, %v457_v0  ;;  %v296_v55 = vmul.f32 %v288_v53, %v459_v1 }
 0x1ef   : > { %vm299_vm1 = vcmp.ge.f32.partialorder %v295_v54, 0.0  ;;  %vm300_vm2 = vcmp.ge.f32.partialorder %v296_v55, 0.0  ;;  %v303_v56 = vmul.f32 0.2, %v295_v54  ;;  %v304_v57 = vmul.f32 0.2, %v296_v55 }
 0x1f0   : > { %v293_v58 = vpop.permute.xlu1 %292 }
 0x1f1   : > { %v307_v59 = vsel %vm299_vm1, %v295_v54, %v303_v56  ;;  %v308_v60 = vsel %vm300_vm2, %v296_v55, %v304_v57  ;;  %v297_v61 = vmul.f32 %v293_v58, %v461_v2  ;;  %v298_v62 = vmul.f32 %v293_v58, %v465_v4 }
 0x1f2   : > { %311 = vst [vmem:[%s224_s15] sm:$0xff] %v307_v59  ;;  %312 = vst [vmem:[%s224_s15 + $0x8] sm:$0xff] %v308_v60 }
 0x1f3   : > { %vm301_vm3 = vcmp.ge.f32.partialorder %v297_v61, 0.0  ;;  %vm302_vm4 = vcmp.ge.f32.partialorder %v298_v62, 0.0  ;;  %v305_v63 = vmul.f32 0.2, %v297_v61  ;;  %v306_v0 = vmul.f32 0.2, %v298_v62 }
 0x1f5   : > { %v309_v1 = vsel %vm301_vm3, %v297_v61, %v305_v63  ;;  %v310_v3 = vsel %vm302_vm4, %v298_v62, %v306_v0 }
 0x1f6   : > { %313 = vst [vmem:[%s224_s15 + $0x10] sm:$0xff] %v309_v1  ;;  %314 = vst [vmem:[%s224_s15 + $0x18] sm:$0xff] %v310_v3 }
 0x1f7 PF: > { %s15_s18 = sadd.s32 1, %s408_s18  }
 0x1f8   : > { %p12_p4 = scmp.ge.s32.totalorder %s15_s18, 4  }
 0x1fa   :  { %14 = sbr.rel (!%p12_p4) target bundleno = 1 (0x1), region = 70 }

</bundles_post_ra>
